<compile_context>
chip_gen: v7x
topology: tpu7x:2x2x1
jax: 0.10.0
libtpu: 0.0.40
codegen_flags: <defaults>
</compile_context>

<pallas_src>
import functools

import jax
import jax.numpy as jnp
from jax.experimental import pallas as pl
from jax.experimental.pallas import tpu as pltpu


def _summar_encoder_kernel(s0_ref, s1_ref, s2_ref, b0_ref, b1_ref, b2_ref,
                           w1_ref, w2_ref, bias_ref, o_ref):
    """One grid step = one M-tile. All three used layers of both stacks are
    present, so averaging, gate matmul and blend happen in a single pass.

    s*_ref, b*_ref : (tm, H)  layer tiles of the summar / bertsum stacks
    w1_ref, w2_ref : (H, H)   gate_linear.weight halves, pre-transposed, bf16
    bias_ref       : (1, H)   gate_linear.bias (f32)
    o_ref          : (tm, H)  gated output tile
    """
    third = jnp.float32(1.0 / 3.0)
    avg_s = (s0_ref[...].astype(jnp.float32)
             + s1_ref[...].astype(jnp.float32)
             + s2_ref[...].astype(jnp.float32)) * third
    avg_b = (b0_ref[...].astype(jnp.float32)
             + b1_ref[...].astype(jnp.float32)
             + b2_ref[...].astype(jnp.float32)) * third

    # concat(avg_s, avg_b) @ W.T + b  ==  avg_s @ W1 + avg_b @ W2 + b
    # bf16 operands, f32 accumulation on the MXU.
    logits = (
        jnp.dot(avg_s.astype(jnp.bfloat16), w1_ref[...],
                preferred_element_type=jnp.float32)
        + jnp.dot(avg_b.astype(jnp.bfloat16), w2_ref[...],
                  preferred_element_type=jnp.float32)
        + bias_ref[...]
    )
    gate = jax.nn.sigmoid(logits)
    o_ref[...] = (avg_b + gate * (avg_s - avg_b)).astype(o_ref.dtype)


def prepare_gate_params(w, b):
    """One-time (outside jit) split + transpose + bf16 cast of gate params.

    w: [H, 2H] gate_linear.weight, b: [H] gate_linear.bias
    Returns (w1, w2, b2): w1/w2 (H, H) bf16, b2 (1, H) f32.
    """
    hidden = w.shape[0]
    w1 = jnp.asarray(w[:, :hidden].T).astype(jnp.bfloat16)  # pooled (avg_summar) half
    w2 = jnp.asarray(w[:, hidden:].T).astype(jnp.bfloat16)  # feature (avg_bertsum) half
    b2 = jnp.asarray(b, dtype=jnp.float32).reshape(1, hidden)
    return w1, w2, b2


@functools.partial(jax.jit, static_argnames=("tm",))
def summar_encoder_forward(summar_hidden, bertsum_hidden, w1, w2, b2, tm=512):
    """summar_hidden / bertsum_hidden: [NL, B, S, H] stacked BERT hidden states.
    w1, w2, b2: outputs of prepare_gate_params. Returns [B, S, H].
    """
    nl, batch, seq, hidden = summar_hidden.shape
    m = batch * seq
    sh = summar_hidden.reshape(nl, m, hidden)
    bh = bertsum_hidden.reshape(nl, m, hidden)

    # Row tile: full extent for small M, otherwise a multiple of 8 (sublane).
    tm_eff = m if m <= tm else max(8, (tm // 8) * 8)

    in_bytes = jnp.dtype(summar_hidden.dtype).itemsize
    w_bytes = jnp.dtype(w1.dtype).itemsize

    def footprint(t):
        return (6 * 2 * t * hidden * in_bytes     # six double-buffered layer tiles
                + 2 * t * hidden * in_bytes       # double-buffered output tile
                + 2 * hidden * hidden * w_bytes   # w1 + w2 (constant index -> resident)
                + hidden * 4)                     # bias

    # Keep the per-step footprint under ~36 MiB so v7x (64 MiB/TC) has headroom.
    budget = 36 * 2**20
    while m > tm_eff and tm_eff > 64 and footprint(tm_eff) > budget:
        tm_eff = max(64, ((tm_eff // 2) // 8) * 8)

    vmem_limit = int(min(max(int(footprint(tm_eff) * 1.5), 8 * 2**20), 40 * 2**20))

    grid = (pl.cdiv(m, tm_eff),)

    # Only layers {-0, -1, -2} are ever read (Python negative indexing quirk);
    # NL is static at trace time so the layer ids are plain ints baked into
    # the index_maps (no scalar prefetch needed).
    l_ids = (0, (nl - 1) % nl, (nl - 2) % nl)

    def hid_spec(layer):
        return pl.BlockSpec((None, tm_eff, hidden), lambda i, l=layer: (l, i, 0))

    w_spec = pl.BlockSpec((hidden, hidden), lambda i: (0, 0))
    bias_spec = pl.BlockSpec((1, hidden), lambda i: (0, 0))

    out = pl.pallas_call(
        _summar_encoder_kernel,
        out_shape=jax.ShapeDtypeStruct((m, hidden), summar_hidden.dtype),
        grid=grid,
        in_specs=[
            hid_spec(l_ids[0]), hid_spec(l_ids[1]), hid_spec(l_ids[2]),   # summar
            hid_spec(l_ids[0]), hid_spec(l_ids[1]), hid_spec(l_ids[2]),   # bertsum
            w_spec, w_spec, bias_spec,
        ],
        out_specs=pl.BlockSpec((tm_eff, hidden), lambda i: (i, 0)),
        compiler_params=pltpu.CompilerParams(
            dimension_semantics=("parallel",),
            vmem_limit_bytes=vmem_limit,
        ),
    )(sh, sh, sh, bh, bh, bh, w1, w2, b2)

    return out.reshape(batch, seq, hidden)


def _reference(summar_hidden, bertsum_hidden, w, b):
    """Pure-JAX f32 reference mirroring the PyTorch forward."""
    def last_k(hid, k=3):
        tmp = 0
        for i in range(k):
            tmp = tmp + hid[-i]          # -0 quirk preserved
        return tmp / k

    avg_s = last_k(summar_hidden)
    avg_b = last_k(bertsum_hidden)
    h = jnp.concatenate([avg_s, avg_b], axis=-1)
    gate = jax.nn.sigmoid(h @ w.T + b)
    return gate * avg_s + (1.0 - gate) * avg_b


if __name__ == "__main__":
    B, S, H = 2, 8, 32
    NL = 5  # number of stacked hidden states from the (external) BERT

    key = jax.random.PRNGKey(0)
    k_sh, k_bh, k_w = jax.random.split(key, 3)

    summar_hidden = jax.random.normal(k_sh, (NL, B, S, H), dtype=jnp.float32)
    bertsum_hidden = jax.random.normal(k_bh, (NL, B, S, H), dtype=jnp.float32)

    # Gate params: Linear(2H -> H), xavier_normal_ weight, zero bias.
    xavier_std = (2.0 / (2 * H + H)) ** 0.5
    w = xavier_std * jax.random.normal(k_w, (H, 2 * H), dtype=jnp.float32)
    b = jnp.zeros((H,), dtype=jnp.float32)

    w1, w2, b2 = prepare_gate_params(w, b)

    out = summar_encoder_forward(summar_hidden, bertsum_hidden, w1, w2, b2)
    out = jax.block_until_ready(out)

    ref = _reference(summar_hidden, bertsum_hidden, w, b)
    assert out.shape == (B, S, H)
    # Gate matmul runs in bf16 on the MXU (f32 accumulation), so compare with
    # a loosened tolerance against the pure-f32 reference.
    assert jnp.allclose(out, ref, atol=2e-2, rtol=2e-2), "mismatch vs reference"

    print("KERNEL_OK")
</pallas_src>

<mosaic_0001>
module attributes {stable_mosaic.version = 11 : i64} {
  func.func @_summar_encoder_kernel(%arg0: i32, %arg1: memref<1x16x32xf32, #tpu.memory_space<vmem>>, %arg2: memref<1x16x32xf32, #tpu.memory_space<vmem>>, %arg3: memref<1x16x32xf32, #tpu.memory_space<vmem>>, %arg4: memref<1x16x32xf32, #tpu.memory_space<vmem>>, %arg5: memref<1x16x32xf32, #tpu.memory_space<vmem>>, %arg6: memref<1x16x32xf32, #tpu.memory_space<vmem>>, %arg7: memref<32x32xbf16, #tpu.memory_space<vmem>>, %arg8: memref<32x32xbf16, #tpu.memory_space<vmem>>, %arg9: memref<1x32xf32, #tpu.memory_space<vmem>>, %arg10: memref<16x32xf32, #tpu.memory_space<vmem>>) attributes {dimension_semantics = [#tpu.dimension_semantics<parallel>], iteration_bounds = array<i64: 1>, scalar_prefetch = 0 : i64, scratch_operands = 0 : i64, tpu.core_type = #tpu.core_type<tc>, window_params = [{transform_indices = @transform_0, window_bounds = array<i64: 1, 16, 32>}, {transform_indices = @transform_1, window_bounds = array<i64: 1, 16, 32>}, {transform_indices = @transform_2, window_bounds = array<i64: 1, 16, 32>}, {transform_indices = @transform_3, window_bounds = array<i64: 1, 16, 32>}, {transform_indices = @transform_4, window_bounds = array<i64: 1, 16, 32>}, {transform_indices = @transform_5, window_bounds = array<i64: 1, 16, 32>}, {pipeline_mode = #tpu.pipeline_mode<synchronous>, transform_indices = @transform_6, window_bounds = array<i64: 32, 32>}, {pipeline_mode = #tpu.pipeline_mode<synchronous>, transform_indices = @transform_7, window_bounds = array<i64: 32, 32>}, {pipeline_mode = #tpu.pipeline_mode<synchronous>, transform_indices = @transform_8, window_bounds = array<i64: 1, 32>}, {transform_indices = @transform_9, window_bounds = array<i64: 16, 32>}]} {
    %c0 = arith.constant 0 : index
    %c0_0 = arith.constant 0 : index
    %c0_1 = arith.constant 0 : index
    %0 = vector.load %arg1[%c0, %c0_0, %c0_1] : memref<1x16x32xf32, #tpu.memory_space<vmem>>, vector<1x16x32xf32>
    %1 = vector.shape_cast %0 : vector<1x16x32xf32> to vector<16x32xf32>
    %c0_2 = arith.constant 0 : index
    %c0_3 = arith.constant 0 : index
    %c0_4 = arith.constant 0 : index
    %2 = vector.load %arg2[%c0_2, %c0_3, %c0_4] : memref<1x16x32xf32, #tpu.memory_space<vmem>>, vector<1x16x32xf32>
    %3 = vector.shape_cast %2 : vector<1x16x32xf32> to vector<16x32xf32>
    %4 = arith.addf %1, %3 : vector<16x32xf32>
    %c0_5 = arith.constant 0 : index
    %c0_6 = arith.constant 0 : index
    %c0_7 = arith.constant 0 : index
    %5 = vector.load %arg3[%c0_5, %c0_6, %c0_7] : memref<1x16x32xf32, #tpu.memory_space<vmem>>, vector<1x16x32xf32>
    %6 = vector.shape_cast %5 : vector<1x16x32xf32> to vector<16x32xf32>
    %7 = arith.addf %4, %6 : vector<16x32xf32>
    %cst = arith.constant 0.333333343 : f32
    %8 = vector.broadcast %cst : f32 to vector<16x32xf32>
    %9 = arith.mulf %7, %8 : vector<16x32xf32>
    %c0_8 = arith.constant 0 : index
    %c0_9 = arith.constant 0 : index
    %c0_10 = arith.constant 0 : index
    %10 = vector.load %arg4[%c0_8, %c0_9, %c0_10] : memref<1x16x32xf32, #tpu.memory_space<vmem>>, vector<1x16x32xf32>
    %11 = vector.shape_cast %10 : vector<1x16x32xf32> to vector<16x32xf32>
    %c0_11 = arith.constant 0 : index
    %c0_12 = arith.constant 0 : index
    %c0_13 = arith.constant 0 : index
    %12 = vector.load %arg5[%c0_11, %c0_12, %c0_13] : memref<1x16x32xf32, #tpu.memory_space<vmem>>, vector<1x16x32xf32>
    %13 = vector.shape_cast %12 : vector<1x16x32xf32> to vector<16x32xf32>
    %14 = arith.addf %11, %13 : vector<16x32xf32>
    %c0_14 = arith.constant 0 : index
    %c0_15 = arith.constant 0 : index
    %c0_16 = arith.constant 0 : index
    %15 = vector.load %arg6[%c0_14, %c0_15, %c0_16] : memref<1x16x32xf32, #tpu.memory_space<vmem>>, vector<1x16x32xf32>
    %16 = vector.shape_cast %15 : vector<1x16x32xf32> to vector<16x32xf32>
    %17 = arith.addf %14, %16 : vector<16x32xf32>
    %cst_17 = arith.constant 0.333333343 : f32
    %18 = vector.broadcast %cst_17 : f32 to vector<16x32xf32>
    %19 = arith.mulf %17, %18 : vector<16x32xf32>
    %20 = arith.truncf %9 : vector<16x32xf32> to vector<16x32xbf16>
    %c0_18 = arith.constant 0 : index
    %c0_19 = arith.constant 0 : index
    %21 = vector.load %arg7[%c0_18, %c0_19] : memref<32x32xbf16, #tpu.memory_space<vmem>>, vector<32x32xbf16>
    %cst_20 = arith.constant dense<0.000000e+00> : vector<16x32xf32>
    %22 = tpu.matmul %20, %21, %cst_20 {dimension_numbers = #tpu.dot_dimension_numbers<[1], [0], [0], [1], [0, 0, 1, 1], [], []>} : vector<16x32xbf16>, vector<32x32xbf16>, vector<16x32xf32> -> vector<16x32xf32>
    %23 = arith.truncf %19 : vector<16x32xf32> to vector<16x32xbf16>
    %c0_21 = arith.constant 0 : index
    %c0_22 = arith.constant 0 : index
    %24 = vector.load %arg8[%c0_21, %c0_22] : memref<32x32xbf16, #tpu.memory_space<vmem>>, vector<32x32xbf16>
    %cst_23 = arith.constant dense<0.000000e+00> : vector<16x32xf32>
    %25 = tpu.matmul %23, %24, %cst_23 {dimension_numbers = #tpu.dot_dimension_numbers<[1], [0], [0], [1], [0, 0, 1, 1], [], []>} : vector<16x32xbf16>, vector<32x32xbf16>, vector<16x32xf32> -> vector<16x32xf32>
    %26 = arith.addf %22, %25 : vector<16x32xf32>
    %c0_24 = arith.constant 0 : index
    %c0_25 = arith.constant 0 : index
    %27 = vector.load %arg9[%c0_24, %c0_25] : memref<1x32xf32, #tpu.memory_space<vmem>>, vector<1x32xf32>
    %28 = vector.broadcast %27 : vector<1x32xf32> to vector<16x32xf32>
    %29 = arith.addf %26, %28 : vector<16x32xf32>
    %30 = arith.negf %29 : vector<16x32xf32>
    %31 = math.exp %30 : vector<16x32xf32>
    %cst_26 = arith.constant 1.000000e+00 : f32
    %32 = vector.broadcast %cst_26 : f32 to vector<16x32xf32>
    %33 = arith.addf %32, %31 : vector<16x32xf32>
    %34 = arith.divf %32, %33 : vector<16x32xf32>
    %35 = arith.subf %9, %19 : vector<16x32xf32>
    %36 = arith.mulf %34, %35 : vector<16x32xf32>
    %37 = arith.addf %19, %36 : vector<16x32xf32>
    %c0_27 = arith.constant 0 : index
    %c0_28 = arith.constant 0 : index
    %38 = vector.load %arg10[%c0_27, %c0_28] : memref<16x32xf32, #tpu.memory_space<vmem>>, vector<16x32xf32>
    tpu.vector_store %arg10[%c0_27, %c0_28], %37 {strides = array<i32>} : memref<16x32xf32, #tpu.memory_space<vmem>>, vector<16x32xf32>,
    return
  }
  func.func @transform_0(%arg0: i32) -> (i32, i32, i32) {
    %c0_i32 = arith.constant 0 : i32
    %c0_i32_0 = arith.constant 0 : i32
    %c0_i32_1 = arith.constant 0 : i32
    return %c0_i32, %arg0, %c0_i32_0 : i32, i32, i32
  }
  func.func @transform_1(%arg0: i32) -> (i32, i32, i32) {
    %c4_i32 = arith.constant 4 : i32
    %c0_i32 = arith.constant 0 : i32
    %c0_i32_0 = arith.constant 0 : i32
    return %c4_i32, %arg0, %c0_i32 : i32, i32, i32
  }
  func.func @transform_2(%arg0: i32) -> (i32, i32, i32) {
    %c3_i32 = arith.constant 3 : i32
    %c0_i32 = arith.constant 0 : i32
    %c0_i32_0 = arith.constant 0 : i32
    return %c3_i32, %arg0, %c0_i32 : i32, i32, i32
  }
  func.func @transform_3(%arg0: i32) -> (i32, i32, i32) {
    %c0_i32 = arith.constant 0 : i32
    %c0_i32_0 = arith.constant 0 : i32
    %c0_i32_1 = arith.constant 0 : i32
    return %c0_i32, %arg0, %c0_i32_0 : i32, i32, i32
  }
  func.func @transform_4(%arg0: i32) -> (i32, i32, i32) {
    %c4_i32 = arith.constant 4 : i32
    %c0_i32 = arith.constant 0 : i32
    %c0_i32_0 = arith.constant 0 : i32
    return %c4_i32, %arg0, %c0_i32 : i32, i32, i32
  }
  func.func @transform_5(%arg0: i32) -> (i32, i32, i32) {
    %c3_i32 = arith.constant 3 : i32
    %c0_i32 = arith.constant 0 : i32
    %c0_i32_0 = arith.constant 0 : i32
    return %c3_i32, %arg0, %c0_i32 : i32, i32, i32
  }
  func.func @transform_6(%arg0: i32) -> (i32, i32) {
    %c0_i32 = arith.constant 0 : i32
    %c0_i32_0 = arith.constant 0 : i32
    %c0_i32_1 = arith.constant 0 : i32
    return %c0_i32, %c0_i32_0 : i32, i32
  }
  func.func @transform_7(%arg0: i32) -> (i32, i32) {
    %c0_i32 = arith.constant 0 : i32
    %c0_i32_0 = arith.constant 0 : i32
    %c0_i32_1 = arith.constant 0 : i32
    return %c0_i32, %c0_i32_0 : i32, i32
  }
  func.func @transform_8(%arg0: i32) -> (i32, i32) {
    %c0_i32 = arith.constant 0 : i32
    %c0_i32_0 = arith.constant 0 : i32
    %c0_i32_1 = arith.constant 0 : i32
    return %c0_i32, %c0_i32_0 : i32, i32
  }
  func.func @transform_9(%arg0: i32) -> (i32, i32) {
    %c0_i32 = arith.constant 0 : i32
    %c0_i32_0 = arith.constant 0 : i32
    return %arg0, %c0_i32 : i32, i32
  }
}

</mosaic_0001>

<bundles_post_ra>
// kernel: summar_encoder_forward.1
= control target key start
LH: loop header
LB: loop body
LE: loop exit
PB: predicated region body
PF: predicated region fallthrough
CT: control target
= control target key end

     0   :  { %14 = vsyncpa [#allocation3], 0  ;;  %s797_s0 = inlined_call_operand.hbm [shape: f32[5,16,32], index: 0, kind: input, shape index: {}, may-alias: {0,1,2}]   ;;  %s798_s1 = inlined_call_operand.hbm [shape: f32[5,16,32], index: 1, kind: input, shape index: {}, may-alias: {0,1,2}]   ;;  %s799_s2 = inlined_call_operand.hbm [shape: f32[5,16,32], index: 2, kind: input, shape index: {}, may-alias: {0,1,2}]   ;;  %s800_s3 = inlined_call_operand.hbm [shape: f32[5,16,32], index: 3, kind: input, shape index: {}, may-alias: {3,4,5}]   ;;  %s801_s4 = inlined_call_operand.hbm [shape: f32[5,16,32], index: 4, kind: input, shape index: {}, may-alias: {3,4,5}]   ;;  %s802_s5 = inlined_call_operand.hbm [shape: f32[5,16,32], index: 5, kind: input, shape index: {}, may-alias: {3,4,5}]   ;;  %s803_s6 = inlined_call_operand.hbm [shape: bf16[32,32], index: 6, kind: input, shape index: {}]   ;;  %s804_s7 = inlined_call_operand.vmem [shape: bf16[32,32], index: 7, kind: input, shape index: {}]   ;;  %s805_s8 = inlined_call_operand.vmem [shape: f32[1,32], index: 8, kind: input, shape index: {}]   ;;  %s806_s9 = inlined_call_operand.hbm [shape: f32[16,32], index: 9, kind: output, shape index: {}]  }
   0x1   :  { %15 = vsyncpa [#allocation6], 0 }
   0x2   :  { %16 = vsyncpa [#allocation9], 0 }
   0x3   :  { %17 = vsyncpa [#allocation12], 0 }
   0x4   :  { %18 = vsyncpa [#allocation4], 0  ;;  %s36_s11 = scalar_lea.hbm %s798_s1, 1024  ;;  %s584_s12 = smov [#allocation5]  }
   0x5   :  { %s37_s13 = sshll.u32 %s584_s12, 4  ;;  %s585_s14 = smov [#allocation8]   ;;  %s38_s13 = int_to_ptr.vmem [resolvable:$true] %s37_s13 }
   0x6   :  { %s62_s15 = sshll.u32 %s585_s14, 4  ;;  %s410_s18 = scalar_lea.hbm %s798_s1, 1280  ;;  %s63_s15 = int_to_ptr.vmem [resolvable:$true] %s62_s15 }
   0x7   :  { %p387_p0 = scmp.ne.s32.totalorder %s36_s11, %s410_s18  ;;  %p389_p1 = scmp.lt.u32.totalorder %s36_s11, %s798_s1 }
   0x8   :  { %p390_p2 = scmp.lt.u32.totalorder %s410_s18, %s410_s18  ;;  %p392_p4 = scmp.lt.u32.totalorder %s410_s18, %s36_s11 }
   0xa   :  { %p391_p3 = por %p390_p2, %p389_p1 }
   0xc   :  { %p393_p5 = por %p392_p4, %p391_p3 }
   0xe   :  { %p394_p6 = pnand %p393_p5, %p387_p0 }
  0x10   :  { %397 = shalt.err (!%p394_p6)
}
  0x11   :  { %s398_s21 = scalar_lea.vmem %s38_s13, 256  ;;  %p403_p8 = scmp.lt.s32.totalorder %s38_s13, %s38_s13 }
  0x12   :  { %p399_p7 = scmp.ne.s32.totalorder %s38_s13, %s398_s21  ;;  %p404_p9 = scmp.lt.s32.totalorder %s398_s21, %s398_s21 }
  0x14   :  { %p405_p10 = por %p404_p9, %p403_p8 }
  0x16   :  { %p406_p11 = pnand %p405_p10, %p399_p7 }
  0x18   :  { %409 = shalt.err (!%p406_p11)
}
  0x19   :  { %s586_s22 = smov 128   ;;  %s587_s23 = smov 8  }
  0x1a   :  { %43 = dma.hbm_to_vmem [thread:$0]  %s36_s11, 256, %s38_s13, [#allocation6], %s586_s22, %s586_s22, %s587_s23  }
  0x1b   :  { %s663_s25 = scalar_lea.hbm %s802_s5, 768  ;;  %s411_s28 = scalar_lea.hbm %s800_s3, 256 }
  0x1c   :  { %p412_p12 = scmp.ne.s32.totalorder %s800_s3, %s411_s28  ;;  %s413_s14 = scalar_lea.hbm %s800_s3, 1280 }
  0x1d   :  { %p414_p13 = scmp.lt.u32.totalorder %s413_s14, %s411_s28  ;;  %p415_p0 = scmp.lt.u32.totalorder %s411_s28, %s800_s3 }
  0x1f   :  { %p416_p1 = por %p415_p0, %p414_p13 }
  0x21   :  { %p417_p2 = pnand %p416_p1, %p412_p12 }
  0x23   :  { %420 = shalt.err (!%p417_p2)
}
  0x24   :  { %s421_s16 = scalar_lea.vmem %s63_s15, 256  ;;  %p426_p4 = scmp.lt.s32.totalorder %s63_s15, %s63_s15 }
  0x25   :  { %p422_p3 = scmp.ne.s32.totalorder %s63_s15, %s421_s16  ;;  %p427_p5 = scmp.lt.s32.totalorder %s421_s16, %s421_s16 }
  0x27   :  { %p428_p6 = por %p427_p5, %p426_p4 }
  0x29   :  { %p429_p7 = pnand %p428_p6, %p422_p3 }
  0x2b   :  { %432 = shalt.err (!%p429_p7)
}
  0x2c   :  { %68 = dma.hbm_to_vmem [thread:$0]  %s800_s3, 256, %s63_s15, [#allocation9], %s586_s22, %s586_s22, %s587_s23  }
  0x2d   :  { %s588_s19 = smov [#allocation11]   ;;  %s589_s21 = smov [#allocation2]  }
  0x2e   :  { %s88_s20 = sshll.u32 %s588_s19, 4  ;;  %s24_s1 = sshll.u32 %s589_s21, 4  ;;  %s89_s20 = int_to_ptr.vmem [resolvable:$true] %s88_s20  ;;  %s683_s1 = int_to_ptr.vmem [resolvable:$true] %s24_s1 }
  0x2f   :  { %s457_s27 = scalar_lea.hbm %s802_s5, 1024  ;;  %s435_s30 = scalar_lea.hbm %s802_s5, 1280 }
  0x30   :  { %p434_p8 = scmp.ne.s32.totalorder %s663_s25, %s457_s27  ;;  %p436_p9 = scmp.lt.u32.totalorder %s663_s25, %s802_s5 }
  0x31   :  { %p437_p10 = scmp.lt.u32.totalorder %s435_s30, %s457_s27  ;;  %p439_p12 = scmp.lt.u32.totalorder %s457_s27, %s663_s25 }
  0x33   :  { %p438_p11 = por %p437_p10, %p436_p9 }
  0x35   :  { %p440_p13 = por %p439_p12, %p438_p11 }
  0x37   :  { %p441_p0 = pnand %p440_p13, %p434_p8 }
  0x39   :  { %444 = shalt.err (!%p441_p0)
}
  0x3a   :  { %s445_s3 = scalar_lea.vmem %s89_s20, 256  ;;  %p450_p2 = scmp.lt.s32.totalorder %s89_s20, %s89_s20 }
  0x3b   :  { %p446_p1 = scmp.ne.s32.totalorder %s89_s20, %s445_s3  ;;  %p451_p3 = scmp.lt.s32.totalorder %s445_s3, %s445_s3 }
  0x3d   :  { %p452_p4 = por %p451_p3, %p450_p2 }
  0x3f   :  { %p453_p5 = pnand %p452_p4, %p446_p1 }
  0x41   :  { %456 = shalt.err (!%p453_p5)
}
  0x42   :  { %94 = dma.hbm_to_vmem [thread:$0]  %s663_s25, 256, %s89_s20, [#allocation12], %s586_s22, %s586_s22, %s587_s23  }
  0x43   :  { %s458_s14 = scalar_lea.hbm %s797_s0, 256  ;;  %s460_s18 = scalar_lea.hbm %s797_s0, 1280 }
  0x44   :  { %p459_p6 = scmp.ne.s32.totalorder %s797_s0, %s458_s14  ;;  %p461_p7 = scmp.lt.u32.totalorder %s460_s18, %s458_s14 }
  0x45   :  { %p462_p8 = scmp.lt.u32.totalorder %s458_s14, %s797_s0 }
  0x47   :  { %p463_p9 = por %p462_p8, %p461_p7 }
  0x49   :  { %p464_p10 = pnand %p463_p9, %p459_p6 }
  0x4b   :  { %467 = shalt.err (!%p464_p10)
}
  0x4c   :  { %s468_s25 = scalar_lea.vmem %s683_s1, 256  ;;  %p473_p12 = scmp.lt.s32.totalorder %s683_s1, %s683_s1 }
  0x4d   :  { %p469_p11 = scmp.ne.s32.totalorder %s683_s1, %s468_s25  ;;  %p474_p13 = scmp.lt.s32.totalorder %s468_s25, %s468_s25 }
  0x4f   :  { %p475_p0 = por %p474_p13, %p473_p12 }
  0x51   :  { %p476_p1 = pnand %p475_p0, %p469_p11 }
  0x53   :  { %479 = shalt.err (!%p476_p1)
}
  0x54   :  { %30 = dma.hbm_to_vmem [thread:$0]  %s797_s0, 256, %s683_s1, [#allocation3], %s586_s22, %s586_s22, %s587_s23  }
  0x55   :  { %s49_s28 = scalar_lea.hbm %s799_s2, 768  ;;  %s590_s29 = smov [#allocation7]  }
  0x56   :  { %s50_s30 = sshll.u32 %s590_s29, 4  ;;  %s730_s3 = scalar_lea.hbm %s801_s4, 1024  ;;  %s51_s30 = int_to_ptr.vmem [resolvable:$true] %s50_s30 }
  0x57   :  { %s504_s14 = scalar_lea.hbm %s799_s2, 1024  ;;  %s482_s0 = scalar_lea.hbm %s799_s2, 1280 }
  0x58   :  { %p481_p2 = scmp.ne.s32.totalorder %s49_s28, %s504_s14  ;;  %p483_p3 = scmp.lt.u32.totalorder %s49_s28, %s799_s2 }
  0x59   :  { %p484_p4 = scmp.lt.u32.totalorder %s482_s0, %s504_s14  ;;  %p486_p6 = scmp.lt.u32.totalorder %s504_s14, %s49_s28 }
  0x5b   :  { %p485_p5 = por %p484_p4, %p483_p3 }
  0x5d   :  { %p487_p7 = por %p486_p6, %p485_p5 }
  0x5f   :  { %p488_p8 = pnand %p487_p7, %p481_p2 }
  0x61   :  { %491 = shalt.err (!%p488_p8)
}
  0x62   :  { %s492_s17 = scalar_lea.vmem %s51_s30, 256  ;;  %p497_p10 = scmp.lt.s32.totalorder %s51_s30, %s51_s30 }
  0x63   :  { %p493_p9 = scmp.ne.s32.totalorder %s51_s30, %s492_s17  ;;  %p498_p11 = scmp.lt.s32.totalorder %s492_s17, %s492_s17 }
  0x65   :  { %p499_p12 = por %p498_p11, %p497_p10 }
  0x67   :  { %p500_p13 = pnand %p499_p12, %p493_p9 }
  0x69   :  { %503 = shalt.err (!%p500_p13)
}
  0x6a   :  { %56 = dma.hbm_to_vmem [thread:$0]  %s49_s28, 256, %s51_s30, [#allocation6], %s586_s22, %s586_s22, %s587_s23  }
  0x6b   :  { %s591_s2 = smov [#allocation10]   ;;  %s592_s19 = smov [#allocation13]  }
  0x6c   :  { %s75_s18 = sshll.u32 %s591_s2, 4  ;;  %s100_s21 = sshll.u32 %s592_s19, 4  ;;  %s76_s18 = int_to_ptr.vmem [resolvable:$true] %s75_s18  ;;  %s101_s21 = int_to_ptr.vmem [resolvable:$true] %s100_s21 }
  0x6d   :  { %s529_s24 = scalar_lea.hbm %s801_s4, 1280  ;;  %p508_p1 = scmp.lt.u32.totalorder %s730_s3, %s801_s4 }
  0x6e   :  { %p506_p0 = scmp.ne.s32.totalorder %s730_s3, %s529_s24  ;;  %p509_p2 = scmp.lt.u32.totalorder %s529_s24, %s529_s24 }
  0x6f   :  { %p511_p4 = scmp.lt.u32.totalorder %s529_s24, %s730_s3 }
  0x70   :  { %p510_p3 = por %p509_p2, %p508_p1 }
  0x72   :  { %p512_p5 = por %p511_p4, %p510_p3 }
  0x74   :  { %p513_p6 = pnand %p512_p5, %p506_p0 }
  0x76   :  { %516 = shalt.err (!%p513_p6)
}
  0x77   :  { %s517_s28 = scalar_lea.vmem %s76_s18, 256  ;;  %p522_p8 = scmp.lt.s32.totalorder %s76_s18, %s76_s18 }
  0x78   :  { %p518_p7 = scmp.ne.s32.totalorder %s76_s18, %s517_s28  ;;  %p523_p9 = scmp.lt.s32.totalorder %s517_s28, %s517_s28 }
  0x7a   :  { %p524_p10 = por %p523_p9, %p522_p8 }
  0x7c   :  { %p525_p11 = pnand %p524_p10, %p518_p7 }
  0x7e   :  { %528 = shalt.err (!%p525_p11)
}
  0x7f   :  { %81 = dma.hbm_to_vmem [thread:$0]  %s730_s3, 256, %s76_s18, [#allocation9], %s586_s22, %s586_s22, %s587_s23  }
  0x80   :  { %s530_s30 = scalar_lea.hbm %s803_s6, 256 }
  0x81   :  { %p531_p12 = scmp.ne.s32.totalorder %s803_s6, %s530_s30  ;;  %p534_p13 = scmp.lt.u32.totalorder %s530_s30, %s803_s6 }
  0x83   :  { %p536_p0 = pnand %p534_p13, %p531_p12 }
  0x85   :  { %539 = shalt.err (!%p536_p0)
}
  0x86   :  { %s540_s14 = scalar_lea.vmem %s101_s21, 256  ;;  %p545_p2 = scmp.lt.s32.totalorder %s101_s21, %s101_s21 }
  0x87   :  { %p541_p1 = scmp.ne.s32.totalorder %s101_s21, %s540_s14  ;;  %p546_p3 = scmp.lt.s32.totalorder %s540_s14, %s540_s14 }
  0x89   :  { %p547_p4 = por %p546_p3, %p545_p2 }
  0x8b   :  { %p548_p5 = pnand %p547_p4, %p541_p1 }
  0x8d   :  { %551 = shalt.err (!%p548_p5)
}
  0x8e   :  { %s593_s3 = smov 64   ;;  %s594_s11 = smov 4  }
  0x8f   :  { %106 = dma.hbm_to_vmem [thread:$0]  %s803_s6, 256, %s101_s21, [#allocation12], %s593_s3, %s593_s3, %s594_s11  }
  0x90   :  { %574 = dma.done.wait [#allocation3], 256  }
  0x91   :  { %575 = vsyncadd [#allocation3], 4294967040 }
  0x92   :  { %576 = dma.done.wait [#allocation6], 512  }
  0x93   :  { %577 = vsyncadd [#allocation6], 4294966784 }
  0x94   :  { %578 = dma.done.wait [#allocation9], 512  }
  0x95   :  { %579 = vsyncadd [#allocation9], 4294966784 }
  0x96   :  { %580 = dma.done.wait [#allocation12], 512  }
  0x97   :  { %581 = vsyncadd [#allocation12], 4294966784  ;;  %v595_v0 = vmov 0.0   ;;  %vm596_vm0 = vmmov 0   ;;  %v374_v1 = vld [vmem:[%s804_s7] sm:$0xff]   ;;  %v376_v3 = vld [vmem:[%s804_s7 + $0x8] sm:$0xff]  }
  0x98   :  { %344 = vmatprep.subr.bf16.mxu0 %v595_v0  ;;  %352 = vmatprep.subr.bf16.mxu1 %v595_v0  ;;  %v375_v2 = vld [vmem:[#allocation13] sm:$0xff]   ;;  %v377_v4 = vld [vmem:[#allocation13 + $0x8] sm:$0xff]   ;;  %v145_v5 = vld [vmem:[#allocation8] sm:$0xff]  ;;  %vm179_vm1 = vcmask 261120  }
  0x99   :  { %348 = vmatprep.mubr.msk.bf16.mxu0 %vm596_vm0, %v595_v0  ;;  %356 = vmatprep.mubr.msk.bf16.mxu1 %vm596_vm0, %v595_v0  ;;  %v146_v6 = vld [vmem:[#allocation8 + $0x8] sm:$0xff]  ;;  %v147_v7 = vld [vmem:[#allocation10] sm:$0xff]  ;;  %v148_v8 = vld [vmem:[#allocation10 + $0x8] sm:$0xff] }
  0x9a   :  { %345 = vmatpush3.bf16.msra.mxu0 %v374_v1  ;;  %353 = vmatpush3.bf16.msra.mxu1 %v375_v2  ;;  %v149_v9 = vadd.f32 %v147_v7, %v145_v5  ;;  %v151_v10 = vld [vmem:[#allocation11] sm:$0xff]  ;;  %v152_v11 = vld [vmem:[#allocation11 + $0x8] sm:$0xff]  ;;  %v150_v12 = vadd.f32 %v148_v8, %v146_v6  ;;  %v133_v13 = vld [vmem:[#allocation2] sm:$0xff] }
  0x9b   :  { %346 = vmatprep.subr.bf16.mxu0 %v595_v0  ;;  %354 = vmatprep.subr.bf16.mxu1 %v595_v0  ;;  %v134_v14 = vld [vmem:[#allocation2 + $0x8] sm:$0xff]  ;;  %v135_v15 = vld [vmem:[#allocation5] sm:$0xff]  ;;  %v136_v17 = vld [vmem:[#allocation5 + $0x8] sm:$0xff] }
  0x9c   :  { %v153_v16 = vadd.f32 %v151_v10, %v149_v9  ;;  %v137_v18 = vadd.f32 %v135_v15, %v133_v13  ;;  %v139_v19 = vld [vmem:[#allocation7] sm:$0xff]  ;;  %v140_v20 = vld [vmem:[#allocation7 + $0x8] sm:$0xff]  ;;  %v154_v21 = vadd.f32 %v152_v11, %v150_v12  ;;  %v138_v22 = vadd.f32 %v136_v17, %v134_v14 }
  0x9d   :  { %v335_v34 = vld [vmem:[%s805_s8] ss:$0 sm:$0xff]  ;;  %s597_s8 = smov [#allocation14]  }
  0x9e   :  { %347 = vmatpush3.bf16.msra.mxu0 %v376_v3  ;;  %355 = vmatpush3.bf16.msra.mxu1 %v377_v4  ;;  %v155_v23 = vmul.f32 0.33333334, %v153_v16  ;;  %v141_v24 = vadd.f32 %v139_v19, %v137_v18  ;;  %v156_v25 = vmul.f32 0.33333334, %v154_v21  ;;  %v142_v26 = vadd.f32 %v140_v20, %v138_v22  ;;  %s314_s18 = sshll.u32 %s597_s8, 4  ;;  %s315_s18 = int_to_ptr.vmem [resolvable:$true] %s314_s18 }
  0x9f   :  { %s552_s19 = scalar_lea.vmem %s315_s18, 256  ;;  %p557_p7 = scmp.lt.s32.totalorder %s315_s18, %s315_s18 }
  0xa0   :  { %v143_v27 = vmul.f32 0.33333334, %v141_v24  ;;  %v162_v28 = vpack.c.bf16 %v156_v25, %v155_v23  ;;  %v144_v29 = vmul.f32 0.33333334, %v142_v26  ;;  %p553_p6 = scmp.ne.s32.totalorder %s315_s18, %s552_s19  ;;  %p558_p8 = scmp.lt.s32.totalorder %s552_s19, %s552_s19 }
  0xa2   :  { %349 = vmatmul.mubr.msk.bf16.vlgmr.msra.gmra.mrb[0].mxu0 %vm179_vm1, %v162_v28  ;;  %v157_v30 = vpack.c.bf16 %v144_v29, %v143_v27  ;;  %v301_v50 = vsub.f32 %v143_v27, %v155_v23  ;;  %v302_v51 = vsub.f32 %v144_v29, %v156_v25  ;;  %p559_p9 = por %p558_p8, %p557_p7 }
  0xa4   :  { %357 = vmatmul.mubr.msk.bf16.vlgmr.msra.gmra.mrb[0].mxu1 %vm179_vm1, %v157_v30  ;;  %p560_p10 = pnand %p559_p9, %p553_p6 }
 0x175   :  { %v217_v31 = vpop.f32.mrb[0].mxu0 }
 0x176   :  { %v350_v32 = vpop.f32.mrb[1].mxu0 }
 0x177   :  { %v273_v33 = vpop.f32.mrb[0].mxu1  ;;  %v220_v35 = vpop.f32.mrb[2].mxu0 }
 0x178   :  { %v274_v36 = vadd.f32 %v273_v33, %v217_v31  ;;  %v358_v37 = vpop.f32.mrb[1].mxu1  ;;  %v351_v38 = vpop.f32.mrb[3].mxu0 }
 0x179   :  { %v276_v39 = vpop.f32.mrb[2].mxu1 }
 0x17a   :  { %v287_v40 = vadd.f32 %v335_v34, %v274_v36  ;;  %v277_v41 = vadd.f32 %v276_v39, %v220_v35  ;;  %v359_v42 = vpop.f32.mrb[3].mxu1 }
 0x17c   :  { %v336_v43 = vmul.f32 -1.442695, %v287_v40  ;;  %v288_v44 = vadd.f32 %v335_v34, %v277_v41 }
 0x17e   :  { %378 = vpow2.f32 %v336_v43  ;;  %v337_v45 = vmul.f32 -1.442695, %v288_v44 }
 0x180   :  { %380 = vpow2.f32 %v337_v45 }
 0x188   :  { %v379_v46 = vpop.eup %378 }
 0x189   :  { %v295_v47 = vadd.f32 1.0, %v379_v46 }
 0x18a   :  { %v381_v48 = vpop.eup %380 }
 0x18b   :  { %382 = vrcp.f32 %v295_v47  ;;  %v296_v49 = vadd.f32 1.0, %v381_v48 }
 0x18d   :  { %384 = vrcp.f32 %v296_v49 }
 0x195   :  { %v383_v52 = vpop.eup %382 }
 0x196   :  { %v303_v53 = vmul.f32 %v383_v52, %v301_v50 }
 0x197   :  { %v385_v54 = vpop.eup %384 }
 0x198   :  { %v304_v55 = vmul.f32 %v385_v54, %v302_v51  ;;  %v305_v56 = vadd.f32 %v303_v53, %v155_v23 }
 0x19a   :  { %v306_v57 = vadd.f32 %v304_v55, %v156_v25  ;;  %307 = vst.msk [vmem:[#allocation14] sm:$0xff] %vm179_vm1, %v305_v56 }
 0x19c   :  { %308 = vst.msk [vmem:[#allocation14 + $0x8] sm:$0xff] %vm179_vm1, %v306_v57 }
 0x19d   :  { %563 = shalt.err (!%p560_p10)
}
 0x19e   :  { %s564_s20 = scalar_lea.hbm %s806_s9, 256 }
 0x19f   :  { %p565_p11 = scmp.ne.s32.totalorder %s806_s9, %s564_s20  ;;  %p568_p12 = scmp.lt.u32.totalorder %s564_s20, %s806_s9 }
 0x1a1   :  { %p570_p13 = pnand %p568_p12, %p565_p11 }
 0x1a3   :  { %573 = shalt.err (!%p570_p13)
}
 0x1a4   :  { %320 = dma.vmem_to_hbm [thread:$0]  %s315_s18, 256, %s806_s9, [#allocation4], %s586_s22, %s586_s22, %s587_s23  }
 0x1a5   :  { %582 = dma.done.wait [#allocation4], 256  }
 0x1a6   :  { %583 = vsyncadd [#allocation4], 4294967040 }
 0x1a7   :  { %324 = vsyncpa [#allocation3], 1 }
 0x1a8   :  { %325 = vsyncpa [#allocation6], 1 }
 0x1a9   :  { %326 = vsyncpa [#allocation9], 1 }
 0x1aa   :  { %327 = vsyncpa [#allocation12], 1 }
 0x1ab   :  { %328 = vsyncpa [#allocation4], 1 }

</bundles_post_ra>
